<compile_context>
chip_gen: v6e
topology: v6e:2x2x1
jax: 0.10.0
libtpu: 0.0.40
codegen_flags: <defaults>
</compile_context>

<pallas_src>
import math

import jax
import jax.numpy as jnp
from jax import lax
from jax.experimental import pallas as pl
from jax.experimental.pallas import tpu as pltpu


# Positions gathered per grid step.  128 = exactly one MXU pass on v5e
# (4x128^2); sweep 256 on v6e/v7x (2x256^2 MXU) for large position counts.
_TILE_POSITIONS = 128

# Below this many positions a plain XLA gather beats a kernel launch.
_FAST_PATH_MAX_POSITIONS = 256


def _gather_tile_kernel(pos_ref, pe_ref, out_ref):
    # pos_ref : (tile, 1) int32 in VMEM (pre-clamped to [0, max_len))
    # pe_ref  : (max_len_pad, d_model) f32 — whole padded table resident in VMEM
    # out_ref : (tile, d_model) — output block for this grid step
    tile = out_ref.shape[0]
    max_len_pad = pe_ref.shape[0]

    pos = pos_ref[...]                                             # (tile, 1)
    col = lax.broadcasted_iota(jnp.int32, (tile, max_len_pad), 1)  # (tile, K)
    onehot = (col == pos).astype(jnp.float32)                      # VPU compare

    # One-hot gather on the MXU: (tile, K) @ (K, d_model), single block store.
    out_ref[...] = jnp.dot(
        onehot, pe_ref[...].astype(jnp.float32),
        preferred_element_type=jnp.float32,
    ).astype(out_ref.dtype)


def positional_encoding_lookup(
    pe: jax.Array,
    positions: jax.Array,
    *,
    force_pallas: bool = False,
    tile: int = _TILE_POSITIONS,
) -> jax.Array:
    """Pallas equivalent of `self.pe[positions]`."""
    max_len, d_model = pe.shape
    out_shape = positions.shape + (d_model,)

    flat_pos = positions.reshape(-1).astype(jnp.int32)
    n = flat_pos.shape[0]

    # Empty-input guard.
    if n == 0:
        return jnp.zeros(out_shape, dtype=pe.dtype)

    # Tiny-n fast path: launching a kernel is pure fixed cost at this size.
    if not force_pallas and n < _FAST_PATH_MAX_POSITIONS:
        return jnp.take(pe, jnp.clip(flat_pos, 0, max_len - 1), axis=0).reshape(out_shape)

    # Defensive clamp: the in-kernel one-hot never selects a padded/OOB row.
    # (PyTorch would raise on OOB; here OOB indices map to the clamped row.)
    flat_pos = jnp.clip(flat_pos, 0, max_len - 1)

    # Pad positions up to a whole number of tiles (padded rows gather row 0,
    # then get sliced away).
    n_pad = ((n + tile - 1) // tile) * tile
    if n_pad != n:
        flat_pos = jnp.pad(flat_pos, (0, n_pad - n))
    pos_2d = flat_pos.reshape(n_pad, 1)

    # Pad the PE table along max_len to a multiple of 128 so the one-hot
    # contraction is a clean, aligned MXU pass.
    max_len_pad = ((max_len + 127) // 128) * 128
    pe_padded = pe if max_len_pad == max_len else jnp.pad(
        pe, ((0, max_len_pad - max_len), (0, 0)))

    out_flat = pl.pallas_call(
        _gather_tile_kernel,
        out_shape=jax.ShapeDtypeStruct((n_pad, d_model), pe.dtype),
        grid_spec=pltpu.PrefetchScalarGridSpec(
            num_scalar_prefetch=0,
            grid=(n_pad // tile,),  # one step per TILE positions
            in_specs=[
                # Positions: one (tile, 1) VMEM block per grid step.
                pl.BlockSpec((tile, 1), lambda i: (i, 0)),
                # Whole padded PE table resident in VMEM — single bulk copy,
                # no data-dependent DMA.
                pl.BlockSpec(memory_space=pltpu.MemorySpace.VMEM),
            ],
            out_specs=pl.BlockSpec((tile, d_model), lambda i: (i, 0)),
        ),
        compiler_params=pltpu.CompilerParams(
            dimension_semantics=("parallel",),  # independent output tiles
        ),
    )(pos_2d, pe_padded)

    return out_flat[:n].reshape(out_shape)


def make_pe_table(d_model: int, max_len: int = 100) -> jax.Array:
    """Deterministic parameter setup, mirroring PositionalEncoding.__init__."""
    # NOTE: like the torch original, assumes even d_model.
    position = jnp.arange(max_len, dtype=jnp.float32)[:, None]            # (max_len, 1)
    div_term = jnp.exp(
        jnp.arange(0, d_model, 2, dtype=jnp.float32) * (-math.log(10000.0) / d_model)
    )                                                                      # (d_model//2,)
    angles = position * div_term                                           # (max_len, d_model//2)
    pe = jnp.zeros((max_len, d_model), dtype=jnp.float32)
    pe = pe.at[:, 0::2].set(jnp.sin(angles))
    pe = pe.at[:, 1::2].set(jnp.cos(angles))
    return pe


if __name__ == "__main__":
    d_model = 32
    max_len = 100
    batch, seq = 2, 8

    pe = make_pe_table(d_model, max_len)

    key = jax.random.PRNGKey(0)
    positions = jax.random.randint(key, (batch, seq), 0, max_len, dtype=jnp.int32)

    # Force the Pallas path so the kernel itself is exercised at demo size.
    out = positional_encoding_lookup(pe, positions, force_pallas=True)
    out = jax.block_until_ready(out)

    # Pure-JAX reference of the torch forward: pe[positions]
    ref = pe[positions]
    assert out.shape == (batch, seq, d_model), out.shape
    assert out.dtype == jnp.float32
    assert bool(jnp.allclose(out, ref)), "mismatch vs reference gather (pallas path)"

    # Also check the tiny-n fast path agrees.
    out_fast = jax.block_until_ready(positional_encoding_lookup(pe, positions))
    assert bool(jnp.allclose(out_fast, ref)), "mismatch vs reference gather (fast path)"

    # Larger run spanning multiple grid steps (exercises tiling / padding).
    big_pos = jax.random.randint(jax.random.PRNGKey(1), (3, 111), 0, max_len, dtype=jnp.int32)
    out_big = jax.block_until_ready(positional_encoding_lookup(pe, big_pos, force_pallas=True))
    assert bool(jnp.allclose(out_big, pe[big_pos])), "mismatch vs reference gather (multi-tile)"

    print("KERNEL_OK")
</pallas_src>

<mosaic_0001>
module attributes {stable_mosaic.version = 11 : i64} {
  func.func @_gather_tile_kernel(%arg0: i32, %arg1: memref<128x1xi32, #tpu.memory_space<vmem>>, %arg2: memref<128x32xf32, #tpu.memory_space<vmem>>, %arg3: memref<128x32xf32, #tpu.memory_space<vmem>>) attributes {dimension_semantics = [#tpu.dimension_semantics<parallel>], iteration_bounds = array<i64: 1>, scalar_prefetch = 0 : i64, scratch_operands = 0 : i64, tpu.core_type = #tpu.core_type<tc>, window_params = [{transform_indices = @transform_0, window_bounds = array<i64: 128, 1>}, {pipeline_mode = #tpu.pipeline_mode<synchronous>, transform_indices = @transform_1, window_bounds = array<i64: 128, 32>}, {transform_indices = @transform_2, window_bounds = array<i64: 128, 32>}]} {
    %c0 = arith.constant 0 : index
    %c0_0 = arith.constant 0 : index
    %0 = vector.load %arg1[%c0, %c0_0] : memref<128x1xi32, #tpu.memory_space<vmem>>, vector<128x1xi32>
    %1 = tpu.iota {dimensions = array<i32: 1>} : vector<128x128xi32>
    %2 = vector.broadcast %0 : vector<128x1xi32> to vector<128x128xi32>
    %3 = arith.cmpi eq, %1, %2 : vector<128x128xi32>
    %4 = arith.extui %3 : vector<128x128xi1> to vector<128x128xi32>
    %5 = arith.sitofp %4 : vector<128x128xi32> to vector<128x128xf32>
    %c0_1 = arith.constant 0 : index
    %c0_2 = arith.constant 0 : index
    %6 = vector.load %arg2[%c0_1, %c0_2] : memref<128x32xf32, #tpu.memory_space<vmem>>, vector<128x32xf32>
    %cst = arith.constant dense<0.000000e+00> : vector<128x32xf32>
    %7 = tpu.matmul %5, %6, %cst {dimension_numbers = #tpu.dot_dimension_numbers<[1], [0], [0], [1], [0, 0, 1, 1], [], []>} : vector<128x128xf32>, vector<128x32xf32>, vector<128x32xf32> -> vector<128x32xf32>
    %c0_3 = arith.constant 0 : index
    %c0_4 = arith.constant 0 : index
    %8 = vector.load %arg3[%c0_3, %c0_4] : memref<128x32xf32, #tpu.memory_space<vmem>>, vector<128x32xf32>
    tpu.vector_store %arg3[%c0_3, %c0_4], %7 {strides = array<i32>} : memref<128x32xf32, #tpu.memory_space<vmem>>, vector<128x32xf32>,
    return
  }
  func.func @transform_0(%arg0: i32) -> (i32, i32) {
    %c0_i32 = arith.constant 0 : i32
    %c0_i32_0 = arith.constant 0 : i32
    return %arg0, %c0_i32 : i32, i32
  }
  func.func @transform_1(%arg0: i32) -> (i32, i32) {
    %c0_i32 = arith.constant 0 : i32
    %c0_i32_0 = arith.constant 0 : i32
    %c0_i32_1 = arith.constant 0 : i32
    return %c0_i32, %c0_i32_0 : i32, i32
  }
  func.func @transform_2(%arg0: i32) -> (i32, i32) {
    %c0_i32 = arith.constant 0 : i32
    %c0_i32_0 = arith.constant 0 : i32
    return %arg0, %c0_i32 : i32, i32
  }
}

</mosaic_0001>

<bundles_post_ra>
// kernel: tpu_custom_call.1
= control target key start
LH: loop header
LB: loop body
LE: loop exit
PB: predicated region body
PF: predicated region fallthrough
CT: control target
= control target key end

     0   :  { %v463_v0 = vmov 0   ;;  %v27_v33 = vlaneseq  ;;  %v464_v37 = vmov 1.0   ;;  %s640_s0 = inlined_call_operand.vmem [shape: s32[128,1], index: 0, kind: input, shape index: {}]   ;;  %s641_s1 = inlined_call_operand.vmem [shape: f32[128,32], index: 1, kind: input, shape index: {}]   ;;  %s642_s2 = inlined_call_operand.vmem [shape: f32[128,32], index: 2, kind: output, shape index: {}]  }
   0x1   :  { %462 = vset.pattern.permute.xlu1 %v463_v0  ;;  %461 = vset.pattern.permute.xlu0 %v463_v0  ;;  %v12_v1 = vld [vmem:[%s640_s0 + $0x8] sm:$0xff]  ;;  %v11_v2 = vld [vmem:[%s640_s0] sm:$0xff]  ;;  %v140_v5 = vld [vmem:[%s641_s1 + $0x78] sm:$0xff] }
   0x2   :  { %33 = vperm.xlu1 %462, %v12_v1   ;;  %30 = vperm.xlu0 %461, %v11_v2   ;;  %v20_v3 = vld [vmem:[%s640_s0 + $0x48] sm:$0xff]  ;;  %v19_v4 = vld [vmem:[%s640_s0 + $0x40] sm:$0xff]  ;;  %v139_v6 = vld [vmem:[%s641_s1 + $0x70] sm:$0xff]  ;;  %v28_v34 = vand.u32 127, %v27_v33 }
   0x3   :  { %v21_v7 = vld [vmem:[%s640_s0 + $0x50] sm:$0xff]  ;;  %371 = vmatprep.subr.mxu0 %v140_v5  ;;  %427 = vmatprep.subr.mxu1 %v140_v5  ;;  %v138_v9 = vld [vmem:[%s641_s1 + $0x68] sm:$0xff]  ;;  %v22_v10 = vld [vmem:[%s640_s0 + $0x58] sm:$0xff] }
   0x4   :  { %v13_v8 = vld [vmem:[%s640_s0 + $0x10] sm:$0xff]  ;;  %372 = vmatpush3.msra.mxu0 %v140_v5  ;;  %443 = vmatpush3.msra.mxu1 %v140_v5  ;;  %v14_v11 = vld [vmem:[%s640_s0 + $0x18] sm:$0xff]  ;;  %v137_v12 = vld [vmem:[%s641_s1 + $0x60] sm:$0xff] }
   0x5   :  { %373 = vmatprep.subr.mxu0 %v139_v6  ;;  %428 = vmatprep.subr.mxu1 %v139_v6  ;;  %v136_v13 = vld [vmem:[%s641_s1 + $0x58] sm:$0xff]  ;;  %v23_v14 = vld [vmem:[%s640_s0 + $0x60] sm:$0xff]  ;;  %v135_v16 = vld [vmem:[%s641_s1 + $0x50] sm:$0xff] }
   0x6   :  { %57 = vperm.xlu1 %462, %v20_v3   ;;  %54 = vperm.xlu0 %461, %v19_v4   ;;  %v15_v15 = vld [vmem:[%s640_s0 + $0x20] sm:$0xff]  ;;  %v24_v17 = vld [vmem:[%s640_s0 + $0x68] sm:$0xff]  ;;  %v25_v21 = vld [vmem:[%s640_s0 + $0x70] sm:$0xff] }
   0x7   :  { %374 = vmatpush3.msra.mxu0 %v139_v6  ;;  %444 = vmatpush3.msra.mxu1 %v139_v6  ;;  %v16_v18 = vld [vmem:[%s640_s0 + $0x28] sm:$0xff]  ;;  %v133_v20 = vld [vmem:[%s641_s1 + $0x40] sm:$0xff]  ;;  %v17_v22 = vld [vmem:[%s640_s0 + $0x30] sm:$0xff] }
   0x8   :  { %375 = vmatprep.subr.mxu0 %v138_v9  ;;  %429 = vmatprep.subr.mxu1 %v138_v9  ;;  %v134_v19 = vld [vmem:[%s641_s1 + $0x48] sm:$0xff]  ;;  %v132_v23 = vld [vmem:[%s641_s1 + $0x38] sm:$0xff]  ;;  %v131_v26 = vld [vmem:[%s641_s1 + $0x30] sm:$0xff] }
   0x9   :  { %376 = vmatpush3.msra.mxu0 %v138_v9  ;;  %445 = vmatpush3.msra.mxu1 %v138_v9  ;;  %v26_v24 = vld [vmem:[%s640_s0 + $0x78] sm:$0xff]  ;;  %v130_v27 = vld [vmem:[%s641_s1 + $0x28] sm:$0xff]  ;;  %v129_v28 = vld [vmem:[%s641_s1 + $0x20] sm:$0xff] }
   0xa   :  { %60 = vperm.xlu1 %462, %v21_v7   ;;  %36 = vperm.xlu0 %461, %v13_v8   ;;  %v18_v25 = vld [vmem:[%s640_s0 + $0x38] sm:$0xff]  ;;  %v127_v30 = vld [vmem:[%s641_s1 + $0x10] sm:$0xff]  ;;  %v126_v31 = vld [vmem:[%s641_s1 + $0x8] sm:$0xff] }
   0xb   :  { %377 = vmatprep.subr.mxu0 %v137_v12  ;;  %430 = vmatprep.subr.mxu1 %v137_v12  ;;  %v128_v29 = vld [vmem:[%s641_s1 + $0x18] sm:$0xff]  ;;  %v125_v32 = vld [vmem:[%s641_s1] sm:$0xff] }
   0xc   :  { %378 = vmatpush3.msra.mxu0 %v137_v12  ;;  %446 = vmatpush3.msra.mxu1 %v137_v12 }
   0xd   :  { %379 = vmatprep.subr.mxu0 %v136_v13  ;;  %431 = vmatprep.subr.mxu1 %v136_v13 }
   0xe   :  { %63 = vperm.xlu1 %462, %v22_v10   ;;  %39 = vperm.xlu0 %461, %v14_v11  }
   0xf   :  { %380 = vmatpush3.msra.mxu0 %v136_v13  ;;  %447 = vmatpush3.msra.mxu1 %v136_v13 }
  0x10   :  { %381 = vmatprep.subr.mxu0 %v135_v16  ;;  %432 = vmatprep.subr.mxu1 %v135_v16 }
  0x11   :  { %382 = vmatpush3.msra.mxu0 %v135_v16  ;;  %448 = vmatpush3.msra.mxu1 %v135_v16 }
  0x12   :  { %66 = vperm.xlu1 %462, %v23_v14   ;;  %42 = vperm.xlu0 %461, %v15_v15  }
  0x13   :  { %383 = vmatprep.subr.mxu0 %v134_v19  ;;  %433 = vmatprep.subr.mxu1 %v134_v19 }
  0x14   :  { %384 = vmatpush3.msra.mxu0 %v134_v19  ;;  %449 = vmatpush3.msra.mxu1 %v134_v19 }
  0x15   :  { %385 = vmatprep.subr.mxu0 %v133_v20  ;;  %434 = vmatprep.subr.mxu1 %v133_v20 }
  0x16   :  { %69 = vperm.xlu1 %462, %v24_v17   ;;  %45 = vperm.xlu0 %461, %v16_v18  }
  0x17   :  { %386 = vmatpush3.msra.mxu0 %v133_v20  ;;  %450 = vmatpush3.msra.mxu1 %v133_v20 }
  0x18   :  { %387 = vmatprep.subr.mxu0 %v132_v23  ;;  %435 = vmatprep.subr.mxu1 %v132_v23 }
  0x19   :  { %388 = vmatpush3.msra.mxu0 %v132_v23  ;;  %451 = vmatpush3.msra.mxu1 %v132_v23 }
  0x1a   :  { %72 = vperm.xlu1 %462, %v25_v21   ;;  %48 = vperm.xlu0 %461, %v17_v22  }
  0x1b   :  { %389 = vmatprep.subr.mxu0 %v131_v26  ;;  %436 = vmatprep.subr.mxu1 %v131_v26 }
  0x1c   :  { %390 = vmatpush3.msra.mxu0 %v131_v26  ;;  %452 = vmatpush3.msra.mxu1 %v131_v26 }
  0x1d   :  { %391 = vmatprep.subr.mxu0 %v130_v27  ;;  %437 = vmatprep.subr.mxu1 %v130_v27 }
  0x1e   :  { %75 = vperm.xlu1 %462, %v26_v24   ;;  %51 = vperm.xlu0 %461, %v18_v25  }
  0x1f   :  { %392 = vmatpush3.msra.mxu0 %v130_v27  ;;  %453 = vmatpush3.msra.mxu1 %v130_v27 }
  0x20   :  { %393 = vmatprep.subr.mxu0 %v129_v28  ;;  %438 = vmatprep.subr.mxu1 %v129_v28 }
  0x21   :  { %394 = vmatpush3.msra.mxu0 %v129_v28  ;;  %454 = vmatpush3.msra.mxu1 %v129_v28 }
  0x22   :  { %395 = vmatprep.subr.mxu0 %v128_v29  ;;  %439 = vmatprep.subr.mxu1 %v128_v29 }
  0x23   :  { %396 = vmatpush3.msra.mxu0 %v128_v29  ;;  %455 = vmatpush3.msra.mxu1 %v128_v29 }
  0x24   :  { %397 = vmatprep.subr.mxu0 %v127_v30  ;;  %440 = vmatprep.subr.mxu1 %v127_v30 }
  0x25   :  { %398 = vmatpush3.msra.mxu0 %v127_v30  ;;  %456 = vmatpush3.msra.mxu1 %v127_v30 }
  0x26   :  { %399 = vmatprep.subr.mxu0 %v126_v31  ;;  %441 = vmatprep.subr.mxu1 %v126_v31 }
  0x27   :  { %400 = vmatpush3.msra.mxu0 %v126_v31  ;;  %457 = vmatpush3.msra.mxu1 %v126_v31 }
  0x28   :  { %401 = vmatprep.subr.mxu0 %v125_v32  ;;  %442 = vmatprep.subr.mxu1 %v125_v32 }
  0x29   :  { %402 = vmatpush3.msra.mxu0 %v125_v32  ;;  %458 = vmatpush3.msra.mxu1 %v125_v32 }
  0x7d   :  { %v34_v35 = vpop.permute.xlu1 %33  ;;  %v31_v36 = vpop.permute.xlu0 %30 }
  0x7e   :  { %vm78_vm0 = vcmp.eq.s32.totalorder %v28_v34, %v34_v35  ;;  %vm77_vm1 = vcmp.eq.s32.totalorder %v28_v34, %v31_v36 }
  0x7f   :  { %403 = vmatprep.mubr.msk.f32.mxu0 %vm77_vm1, %v464_v37 }
  0x80   :  { %404 = vmatmul.mubr.msk.f32.vlgmr.msra.gmra.mxu0 %vm78_vm0, %v464_v37  ;;  %vm286_vm0 = vcmask 261120  }
  0x81   :  { %v58_v38 = vpop.permute.xlu1 %57  ;;  %v55_v39 = vpop.permute.xlu0 %54 }
  0x82   :  { %vm86_vm2 = vcmp.eq.s32.totalorder %v28_v34, %v58_v38  ;;  %vm85_vm3 = vcmp.eq.s32.totalorder %v28_v34, %v55_v39 }
  0x83   :  { %415 = vmatprep.mubr.msk.f32.mxu1 %vm85_vm3, %v464_v37 }
  0x84   :  { %416 = vmatmul.mubr.msk.f32.vlgmr.msra.gmra.mxu1 %vm86_vm2, %v464_v37 }
  0x85   :  { %v61_v40 = vpop.permute.xlu1 %60  ;;  %v37_v41 = vpop.permute.xlu0 %36 }
  0x86   :  { %vm87_vm4 = vcmp.eq.s32.totalorder %v28_v34, %v61_v40  ;;  %vm79_vm5 = vcmp.eq.s32.totalorder %v28_v34, %v37_v41 }
  0x87   :  { %406 = vmatprep.mubr.msk.f32.mxu0 %vm79_vm5, %v464_v37  ;;  %418 = vmatprep.mubr.msk.f32.mxu1 %vm87_vm4, %v464_v37 }
  0x89   :  { %v64_v42 = vpop.permute.xlu1 %63  ;;  %v40_v43 = vpop.permute.xlu0 %39 }
  0x8a   :  { %vm88_vm6 = vcmp.eq.s32.totalorder %v28_v34, %v64_v42  ;;  %vm80_vm7 = vcmp.eq.s32.totalorder %v28_v34, %v40_v43 }
  0x8b   :  { %407 = vmatmul.mubr.msk.f32.gmra.mxu0 %vm80_vm7, %v464_v37  ;;  %419 = vmatmul.mubr.msk.f32.gmra.mxu1 %vm88_vm6, %v464_v37 }
  0x8d   :  { %v67_v44 = vpop.permute.xlu1 %66  ;;  %v43_v45 = vpop.permute.xlu0 %42 }
  0x8e   :  { %vm89_vm8 = vcmp.eq.s32.totalorder %v28_v34, %v67_v44  ;;  %vm81_vm9 = vcmp.eq.s32.totalorder %v28_v34, %v43_v45 }
  0x8f   :  { %409 = vmatprep.mubr.msk.f32.mxu0 %vm81_vm9, %v464_v37  ;;  %421 = vmatprep.mubr.msk.f32.mxu1 %vm89_vm8, %v464_v37 }
  0x91   :  { %v70_v46 = vpop.permute.xlu1 %69  ;;  %v46_v47 = vpop.permute.xlu0 %45 }
  0x92   :  { %vm90_vm10 = vcmp.eq.s32.totalorder %v28_v34, %v70_v46  ;;  %vm82_vm11 = vcmp.eq.s32.totalorder %v28_v34, %v46_v47 }
  0x93   :  { %410 = vmatmul.mubr.msk.f32.gmra.mxu0 %vm82_vm11, %v464_v37  ;;  %422 = vmatmul.mubr.msk.f32.gmra.mxu1 %vm90_vm10, %v464_v37 }
  0x95   :  { %v73_v48 = vpop.permute.xlu1 %72  ;;  %v49_v49 = vpop.permute.xlu0 %48 }
  0x96   :  { %vm91_vm12 = vcmp.eq.s32.totalorder %v28_v34, %v73_v48  ;;  %vm83_vm13 = vcmp.eq.s32.totalorder %v28_v34, %v49_v49 }
  0x97   :  { %412 = vmatprep.mubr.msk.f32.mxu0 %vm83_vm13, %v464_v37  ;;  %424 = vmatprep.mubr.msk.f32.mxu1 %vm91_vm12, %v464_v37 }
  0x99   :  { %v76_v50 = vpop.permute.xlu1 %75  ;;  %v52_v51 = vpop.permute.xlu0 %51 }
  0x9a   :  { %vm92_vm14 = vcmp.eq.s32.totalorder %v28_v34, %v76_v50  ;;  %vm84_vm15 = vcmp.eq.s32.totalorder %v28_v34, %v52_v51 }
  0x9b   :  { %413 = vmatmul.mubr.msk.f32.gmra.mxu0 %vm84_vm15, %v464_v37  ;;  %425 = vmatmul.mubr.msk.f32.gmra.mxu1 %vm92_vm14, %v464_v37 }
 0x140   :  { %v405_v52 = vpop.f32.mrf.mxu0 }
 0x141   :  { %288 = vst.msk [vmem:[%s642_s2 + $0x8] sm:$0xff] %vm286_vm0, %v405_v52 }
 0x142   :  { %v207_v53 = vpop.f32.mrf.mxu0 }
 0x143   :  { %287 = vst.msk [vmem:[%s642_s2] sm:$0xff] %vm286_vm0, %v207_v53 }
 0x144   :  { %v417_v54 = vpop.f32.mrf.mxu1 }
 0x145   :  { %296 = vst.msk [vmem:[%s642_s2 + $0x48] sm:$0xff] %vm286_vm0, %v417_v54 }
 0x146   :  { %v247_v55 = vpop.f32.mrf.mxu1 }
 0x147   :  { %295 = vst.msk [vmem:[%s642_s2 + $0x40] sm:$0xff] %vm286_vm0, %v247_v55 }
 0x14b   :  { %v408_v56 = vpop.f32.mrf.mxu0  ;;  %v420_v57 = vpop.f32.mrf.mxu1 }
 0x14c   :  { %290 = vst.msk [vmem:[%s642_s2 + $0x18] sm:$0xff] %vm286_vm0, %v408_v56  ;;  %298 = vst.msk [vmem:[%s642_s2 + $0x58] sm:$0xff] %vm286_vm0, %v420_v57 }
 0x14d   :  { %v217_v58 = vpop.f32.mrf.mxu0  ;;  %v257_v59 = vpop.f32.mrf.mxu1 }
 0x14e   :  { %289 = vst.msk [vmem:[%s642_s2 + $0x10] sm:$0xff] %vm286_vm0, %v217_v58  ;;  %297 = vst.msk [vmem:[%s642_s2 + $0x50] sm:$0xff] %vm286_vm0, %v257_v59 }
 0x153   :  { %v411_v60 = vpop.f32.mrf.mxu0  ;;  %v423_v61 = vpop.f32.mrf.mxu1 }
 0x154   :  { %292 = vst.msk [vmem:[%s642_s2 + $0x28] sm:$0xff] %vm286_vm0, %v411_v60  ;;  %300 = vst.msk [vmem:[%s642_s2 + $0x68] sm:$0xff] %vm286_vm0, %v423_v61 }
 0x155   :  { %v227_v62 = vpop.f32.mrf.mxu0  ;;  %v267_v63 = vpop.f32.mrf.mxu1 }
 0x156   :  { %291 = vst.msk [vmem:[%s642_s2 + $0x20] sm:$0xff] %vm286_vm0, %v227_v62  ;;  %299 = vst.msk [vmem:[%s642_s2 + $0x60] sm:$0xff] %vm286_vm0, %v267_v63 }
 0x15b   :  { %v414_v0 = vpop.f32.mrf.mxu0  ;;  %v426_v1 = vpop.f32.mrf.mxu1 }
 0x15c   :  { %294 = vst.msk [vmem:[%s642_s2 + $0x38] sm:$0xff] %vm286_vm0, %v414_v0  ;;  %302 = vst.msk [vmem:[%s642_s2 + $0x78] sm:$0xff] %vm286_vm0, %v426_v1 }
 0x15d   :  { %v237_v2 = vpop.f32.mrf.mxu0  ;;  %v277_v3 = vpop.f32.mrf.mxu1 }
 0x15e   :  { %293 = vst.msk [vmem:[%s642_s2 + $0x30] sm:$0xff] %vm286_vm0, %v237_v2  ;;  %301 = vst.msk [vmem:[%s642_s2 + $0x70] sm:$0xff] %vm286_vm0, %v277_v3 }

</bundles_post_ra>
